<compile_context>
chip_gen: v6e
topology: v6e:2x2x1
jax: 0.10.0
libtpu: 0.0.40
codegen_flags: <defaults>
</compile_context>

<pallas_src>
import functools

import jax
import jax.numpy as jnp
import numpy as np
from jax.experimental import pallas as pl
from jax.experimental.pallas import tpu as pltpu

EDGE_UPDATE_WEIGHT = 0.2


# -----------------------------------------------------------------------------
# Per-generation hints (scoped VMEM budget, MXU group width, TensorCore count).
# -----------------------------------------------------------------------------
def _tpu_hints():
    vmem_cap = 128 << 20
    chip_name = ""
    try:
        info = pltpu.get_tpu_info()
        vmem_cap = int(getattr(info, "vmem_capacity_bytes", vmem_cap))
        chip_name = str(getattr(info, "chip_version", "")).lower()
    except Exception:
        pass
    # Scoped VMEM: ~3/4 of physical, capped at 96 MiB (-> ~48 MiB on v7x's
    # 64 MiB per-TC VMEM, 96 MiB on v5e/v6e's 128 MiB), never below 32 MiB.
    vmem_limit = max(32 << 20, min(vmem_cap * 3 // 4, 96 << 20))
    # Lane-group target for the block-diagonal edge matmul: 256 fills the
    # 256x256 MXUs of v6e/v7x; 128 elsewhere (256-deep groups would do 2x the
    # work on a 128x128 MXU for no gain).
    lane_group = 256 if any(t in chip_name for t in ("v6", "v7", "trillium")) else 128
    # v7x has 2 TensorCores per chip (64 MiB VMEM per TC).
    num_tc = 2 if ("v7" in chip_name or vmem_cap <= (64 << 20)) else 1
    return vmem_limit, lane_group, num_tc


def _pick_group(n, e, lane_target):
    """Largest divisor g of n with g*e <= lane_target (g >= 1)."""
    g_cap = max(1, lane_target // max(e, 1))
    g = 1
    for cand in range(1, min(n, g_cap) + 1):
        if n % cand == 0:
            g = cand
    return g


def _pick_batch_tile(batch, n, e, io_bytes, mm_extra_bytes, vmem_limit, num_tc):
    """Graphs per grid step: largest tile whose edge working set fits VMEM.

    Accounts for 2x double-buffered input + 2x output edge blocks (I/O dtype),
    ~5 live f32 copies of the (N, N*E) slab inside the kernel (edge, prod, c,
    new_edge, edge_new) and up to 2 matmul-dtype cast copies.  On 2-TC chips
    prefer tiles whose grid count splits evenly across cores; on single-TC
    chips just take the largest tile that fits (grid of 1 is fine).
    """
    per_graph = n * n * e * (4 * io_bytes + 5 * 4 + 2 * mm_extra_bytes)
    budget = int(vmem_limit * 0.7)  # headroom for weights / node / small temps
    divisors = [t for t in range(1, batch + 1) if batch % t == 0]
    fits = [t for t in divisors if t * per_graph <= budget] or [1]
    if num_tc > 1:
        even = [t for t in fits if (batch // t) % num_tc == 0]
        if even:
            return max(even)
    return max(fits)


def _group_rows_to_lanes(x, g):
    """(Bt, R, C) -> (Bt, R//g, g*C): move g consecutive rows into lanes.

    Uses static slices + lane concatenation on a small tensor; the slice count
    is bounded by g (<= lane_group // E), independent of N."""
    bt, r, c = x.shape
    if g == 1:
        return x
    rg = r // g
    x3 = x.reshape(bt * rg, g, c)
    out = jnp.concatenate([x3[:, jw, :] for jw in range(g)], axis=-1)
    return out.reshape(bt, rg, g * c)


# -----------------------------------------------------------------------------
# Kernel
# -----------------------------------------------------------------------------
def _gnn_layer_kernel(bt, n, d, e, g, mm_dtype,
                      node_ref, edge_ref,
                      ws_w_ref, ws_b_ref,
                      wm_g_ref, wm_b_ref,
                      wu_node_ref, wu_msg_ref, wu_b_ref,
                      we_self_ref, we_neigh_ref, we_edge_ref, we_b_ref,
                      node_out_ref, edge_out_ref):
    ng = n // g          # lane groups per node row
    gl = g * e           # lanes per group (block-diagonal weight width)
    f32 = jnp.float32
    cast_mm = np.dtype(mm_dtype) != np.dtype(jnp.float32)

    node = node_ref[...].astype(f32)            # (Bt, N, D)
    edge = edge_ref[...].astype(f32)            # (Bt, N*Ng, GL) grouped lane-dense
    node2d = node.reshape(bt * n, d)            # rows = (graph, node i)
    edge2d = edge.reshape(bt * n * ng, gl)      # rows = (graph, node i, group jg)

    ws_w = ws_w_ref[...]
    ws_b = ws_b_ref[...]

    # ---- phase 1: message passing + node update -----------------------------
    shrink = jnp.dot(node2d, ws_w, preferred_element_type=f32) + ws_b   # (Bt*N, E)
    shrink_g = _group_rows_to_lanes(shrink.reshape(bt, n, e), g)        # (Bt, Ng, GL)
    if ng == 1:
        prod = shrink_g * edge                                          # (Bt, N, GL)
    else:
        prod = shrink_g[:, None, :, :] * edge.reshape(bt, n, ng, gl)    # (Bt, N, Ng, GL)
    prod2d = prod.reshape(bt * n * ng, gl)
    if cast_mm:
        prod2d = prod2d.astype(mm_dtype)
    # mean over neighbours (1/N folded into wm_g) + message_gen in one matmul.
    mpart = jnp.dot(prod2d, wm_g_ref[...], preferred_element_type=f32)  # (Bt*N*Ng, M)
    m_dim = mpart.shape[-1]
    if ng > 1:
        message = mpart.reshape(bt * n, ng, m_dim).sum(axis=1)
    else:
        message = mpart.reshape(bt * n, m_dim)
    message = message + wm_b_ref[...]                                   # (Bt*N, M)
    upd = (jnp.dot(node2d, wu_node_ref[...], preferred_element_type=f32)
           + jnp.dot(message, wu_msg_ref[...], preferred_element_type=f32)
           + wu_b_ref[...])
    node_new = node2d + upd                                             # (Bt*N, D)

    # ---- phase 2: edge update -------------------------------------------------
    # new_edge[i, j] = shrink2[i] @ W_self + shrink2[j] @ W_neigh
    #                + edge[i, j] @ W_edge + b        (split-weight rewrite)
    shrink2 = jnp.dot(node_new, ws_w, preferred_element_type=f32) + ws_b   # (Bt*N, E)
    a_g = (jnp.dot(shrink2, we_self_ref[...], preferred_element_type=f32)
           + we_b_ref[...])                                                # (Bt*N, GL)
    bb = jnp.dot(shrink2, we_neigh_ref[...], preferred_element_type=f32)   # (Bt*N, E)
    bb_g = _group_rows_to_lanes(bb.reshape(bt, n, e), g)                   # (Bt, Ng, GL)
    edge_mm2d = edge2d.astype(mm_dtype) if cast_mm else edge2d
    c = jnp.dot(edge_mm2d, we_edge_ref[...], preferred_element_type=f32)   # (Bt*N*Ng, GL)

    if ng == 1:
        new_edge = c.reshape(bt, n, gl) + a_g.reshape(bt, n, gl) + bb_g    # (Bt, N, GL)
        edge_new = jnp.where(edge > 0, edge + EDGE_UPDATE_WEIGHT * new_edge, edge)
        edge_out_ref[...] = edge_new.astype(edge_out_ref.dtype)
    else:
        new_edge = (c.reshape(bt, n, ng, gl)
                    + a_g.reshape(bt, n, 1, gl)
                    + bb_g[:, None, :, :])                                 # (Bt, N, Ng, GL)
        edge4 = edge.reshape(bt, n, ng, gl)
        edge_new = jnp.where(edge4 > 0, edge4 + EDGE_UPDATE_WEIGHT * new_edge, edge4)
        edge_out_ref[...] = edge_new.reshape(bt, n * ng, gl).astype(edge_out_ref.dtype)

    node_out_ref[...] = node_new.reshape(bt, n, d).astype(node_out_ref.dtype)


# -----------------------------------------------------------------------------
# Wrapper
# -----------------------------------------------------------------------------
def gnn_layer_pallas(node_features, edge_features, params, *,
                     batch_tile=None, matmul_dtype=jnp.float32):
    B, N, D = node_features.shape
    _, _, _, E = edge_features.shape
    ws_w, ws_b, wm_w, wm_b, wu_w, wu_b, we_w, we_b = params
    S = ws_w.shape[1]
    if S != E:
        raise ValueError("edge_feature_dim must equal shrink_node_feature_dim "
                         f"(got E={E}, S={S}); required by the shrink*edge product.")

    vmem_limit, lane_group, num_tc = _tpu_hints()
    g = _pick_group(N, E, lane_group)       # nodes folded into one lane group
    ng = N // g
    gl = g * E

    f32 = jnp.float32
    mm = np.dtype(matmul_dtype)
    is_bf_mm = mm != np.dtype(jnp.float32)

    # ---- one-time weight preprocessing (tiny; nothing scales with N^2) -------
    wm_g = jnp.tile(wm_w.astype(f32) / N, (g, 1)).astype(mm)            # (GL, M); folds mean 1/N
    wu_node, wu_msg = wu_w[:D].astype(f32), wu_w[D:].astype(f32)        # split: no concat in kernel
    w_self, w_neigh, w_edge = we_w[:S], we_w[S:2 * S], we_w[2 * S:]
    we_self_g = jnp.tile(w_self.astype(f32), (1, g))                    # (S, GL)
    we_neigh = w_neigh.astype(f32)                                      # (S, E)
    we_edge_g = jnp.kron(jnp.eye(g, dtype=f32), w_edge.astype(f32)).astype(mm)  # (GL, GL) block-diag
    we_b_g = jnp.tile(we_b.astype(f32), (1, g))                         # (1, GL)

    io_bytes = np.dtype(edge_features.dtype).itemsize
    mm_extra = mm.itemsize if is_bf_mm else 0
    if batch_tile is None:
        batch_tile = _pick_batch_tile(B, N, E, io_bytes, mm_extra, vmem_limit, num_tc)
    bt = batch_tile
    if B % bt != 0:
        raise ValueError(f"batch_tile={bt} must divide batch={B}")
    grid = (B // bt,)

    # Grouped lane-dense edge layout (row-major reshape => free, no relayout).
    edge_g_in = edge_features.reshape(B, N * ng, gl)

    kernel = functools.partial(_gnn_layer_kernel, bt, N, D, E, g, mm)

    def rep_spec(shape):
        return pl.BlockSpec(shape, lambda b: (0,) * len(shape))

    grid_spec = pltpu.PrefetchScalarGridSpec(
        num_scalar_prefetch=0,
        grid=grid,
        in_specs=[
            pl.BlockSpec((bt, N, D), lambda b: (b, 0, 0)),        # node features
            pl.BlockSpec((bt, N * ng, gl), lambda b: (b, 0, 0)),  # edge features (grouped)
            rep_spec(ws_w.shape), rep_spec(ws_b.shape),
            rep_spec(wm_g.shape), rep_spec(wm_b.shape),
            rep_spec(wu_node.shape), rep_spec(wu_msg.shape), rep_spec(wu_b.shape),
            rep_spec(we_self_g.shape), rep_spec(we_neigh.shape),
            rep_spec(we_edge_g.shape), rep_spec(we_b_g.shape),
        ],
        out_specs=[
            pl.BlockSpec((bt, N, D), lambda b: (b, 0, 0)),
            pl.BlockSpec((bt, N * ng, gl), lambda b: (b, 0, 0)),
        ],
    )
    out_shape = (
        jax.ShapeDtypeStruct((B, N, D), node_features.dtype),
        jax.ShapeDtypeStruct((B, N * ng, gl), edge_features.dtype),
    )
    node_out, edge_out = pl.pallas_call(
        kernel,
        grid_spec=grid_spec,
        out_shape=out_shape,
        # Edge tensor is updated in place (block g is read and written only at
        # grid step g), halving its HBM residency.
        input_output_aliases={1: 1},
        compiler_params=pltpu.CompilerParams(
            dimension_semantics=("parallel",),
            vmem_limit_bytes=vmem_limit),
    )(node_features, edge_g_in,
      ws_w.astype(f32), ws_b.astype(f32), wm_g, wm_b.astype(f32),
      wu_node, wu_msg, wu_b.astype(f32),
      we_self_g, we_neigh, we_edge_g, we_b_g)
    return node_out, edge_out.reshape(B, N, N, E)


# -----------------------------------------------------------------------------
# Pure-JAX reference of the PyTorch forward (for correctness checking).
# -----------------------------------------------------------------------------
def gnn_layer_reference(node_features, edge_features, params):
    ws_w, ws_b, wm_w, wm_b, wu_w, wu_b, we_w, we_b = params
    node = node_features.astype(jnp.float32)
    edge = edge_features.astype(jnp.float32)

    shrink = node @ ws_w + ws_b                                      # (B, N, S)
    messages_all = shrink[:, None, :, :] * edge                      # (B, N, N, E)
    message = jnp.mean(messages_all, axis=2)                         # (B, N, E)
    message = message @ wm_w + wm_b                                  # (B, N, M)
    upd = jnp.concatenate([node, message], axis=2) @ wu_w + wu_b     # (B, N, D)
    node = node + upd

    shrink = node @ ws_w + ws_b
    s_self = jnp.broadcast_to(shrink[:, :, None, :], edge.shape[:3] + shrink.shape[-1:])
    s_neigh = jnp.broadcast_to(shrink[:, None, :, :], edge.shape[:3] + shrink.shape[-1:])
    edge_in = jnp.concatenate([s_self, s_neigh, edge], axis=3)
    new_edge = edge_in @ we_w + we_b
    mask = (edge > 0).astype(jnp.float32) * EDGE_UPDATE_WEIGHT
    edge = edge + new_edge * mask
    return node, edge


def init_params(key, node_dim, edge_dim, msg_len, shrink_dim):
    """Deterministic nn.Linear-style init: U(-1/sqrt(fan_in), 1/sqrt(fan_in))."""
    def linear(k, fan_in, fan_out):
        kw, kb = jax.random.split(k)
        bound = 1.0 / jnp.sqrt(fan_in)
        w = jax.random.uniform(kw, (fan_in, fan_out), jnp.float32, -bound, bound)
        b = jax.random.uniform(kb, (1, fan_out), jnp.float32, -bound, bound)
        return w, b

    k1, k2, k3, k4 = jax.random.split(key, 4)
    ws_w, ws_b = linear(k1, node_dim, shrink_dim)                 # node_shrink_layer
    wm_w, wm_b = linear(k2, edge_dim, msg_len)                    # message_gen_network
    wu_w, wu_b = linear(k3, node_dim + msg_len, node_dim)         # node_update_network
    we_w, we_b = linear(k4, 2 * shrink_dim + edge_dim, edge_dim)  # edge_update_network
    return (ws_w, ws_b, wm_w, wm_b, wu_w, wu_b, we_w, we_b)


if __name__ == "__main__":
    # Small shapes consistent with the module's forward.
    B, N = 2, 8
    NODE_DIM = 32
    SHRINK_DIM = 16
    EDGE_DIM = SHRINK_DIM      # required by the elementwise product in forward
    MSG_LEN = 16

    key = jax.random.PRNGKey(0)
    k_node, k_edge, k_par = jax.random.split(key, 3)
    node_features = jax.random.normal(k_node, (B, N, NODE_DIM), jnp.float32)
    edge_features = jax.random.normal(k_edge, (B, N, N, EDGE_DIM), jnp.float32)
    params = init_params(k_par, NODE_DIM, EDGE_DIM, MSG_LEN, SHRINK_DIM)

    node_ref, edge_ref = gnn_layer_reference(node_features, edge_features, params)

    # Exact (f32 matmul) path.
    run_f32 = jax.jit(lambda nf, ef: gnn_layer_pallas(nf, ef, params))
    node_out, edge_out = run_f32(node_features, edge_features)
    jax.block_until_ready((node_out, edge_out))
    assert jnp.allclose(node_out, node_ref, rtol=1e-4, atol=1e-4)
    assert jnp.allclose(edge_out, edge_ref, rtol=1e-4, atol=1e-4)

    # Fast path: bf16 matmul operands, f32 accumulation (looser tolerance).
    run_bf16 = jax.jit(
        lambda nf, ef: gnn_layer_pallas(nf, ef, params, matmul_dtype=jnp.bfloat16))
    node_bf, edge_bf = run_bf16(node_features, edge_features)
    jax.block_until_ready((node_bf, edge_bf))
    assert jnp.allclose(node_bf, node_ref, rtol=2e-2, atol=2e-2)
    assert jnp.allclose(edge_bf, edge_ref, rtol=2e-2, atol=2e-2)

    print("KERNEL_OK")
</pallas_src>

<mosaic_0001>
module attributes {stable_mosaic.version = 11 : i64} {
  func.func @_gnn_layer_kernel(%arg0: i32, %arg1: memref<2x8x32xf32, #tpu.memory_space<vmem>>, %arg2: memref<2x8x128xf32, #tpu.memory_space<vmem>>, %arg3: memref<32x16xf32, #tpu.memory_space<vmem>>, %arg4: memref<1x16xf32, #tpu.memory_space<vmem>>, %arg5: memref<128x16xf32, #tpu.memory_space<vmem>>, %arg6: memref<1x16xf32, #tpu.memory_space<vmem>>, %arg7: memref<32x32xf32, #tpu.memory_space<vmem>>, %arg8: memref<16x32xf32, #tpu.memory_space<vmem>>, %arg9: memref<1x32xf32, #tpu.memory_space<vmem>>, %arg10: memref<16x128xf32, #tpu.memory_space<vmem>>, %arg11: memref<16x16xf32, #tpu.memory_space<vmem>>, %arg12: memref<128x128xf32, #tpu.memory_space<vmem>>, %arg13: memref<1x128xf32, #tpu.memory_space<vmem>>, %arg14: memref<2x8x32xf32, #tpu.memory_space<vmem>>, %arg15: memref<2x8x128xf32, #tpu.memory_space<vmem>>) attributes {dimension_semantics = [#tpu.dimension_semantics<parallel>], iteration_bounds = array<i64: 1>, scalar_prefetch = 0 : i64, scratch_operands = 0 : i64, tpu.core_type = #tpu.core_type<tc>, window_params = [{transform_indices = @transform_0, window_bounds = array<i64: 2, 8, 32>}, {transform_indices = @transform_1, window_bounds = array<i64: 2, 8, 128>}, {pipeline_mode = #tpu.pipeline_mode<synchronous>, transform_indices = @transform_2, window_bounds = array<i64: 32, 16>}, {pipeline_mode = #tpu.pipeline_mode<synchronous>, transform_indices = @transform_3, window_bounds = array<i64: 1, 16>}, {pipeline_mode = #tpu.pipeline_mode<synchronous>, transform_indices = @transform_4, window_bounds = array<i64: 128, 16>}, {pipeline_mode = #tpu.pipeline_mode<synchronous>, transform_indices = @transform_5, window_bounds = array<i64: 1, 16>}, {pipeline_mode = #tpu.pipeline_mode<synchronous>, transform_indices = @transform_6, window_bounds = array<i64: 32, 32>}, {pipeline_mode = #tpu.pipeline_mode<synchronous>, transform_indices = @transform_7, window_bounds = array<i64: 16, 32>}, {pipeline_mode = #tpu.pipeline_mode<synchronous>, transform_indices = @transform_8, window_bounds = array<i64: 1, 32>}, {pipeline_mode = #tpu.pipeline_mode<synchronous>, transform_indices = @transform_9, window_bounds = array<i64: 16, 128>}, {pipeline_mode = #tpu.pipeline_mode<synchronous>, transform_indices = @transform_10, window_bounds = array<i64: 16, 16>}, {pipeline_mode = #tpu.pipeline_mode<synchronous>, transform_indices = @transform_11, window_bounds = array<i64: 128, 128>}, {pipeline_mode = #tpu.pipeline_mode<synchronous>, transform_indices = @transform_12, window_bounds = array<i64: 1, 128>}, {transform_indices = @transform_13, window_bounds = array<i64: 2, 8, 32>}, {transform_indices = @transform_14, window_bounds = array<i64: 2, 8, 128>}]} {
    %c0 = arith.constant 0 : index
    %c0_0 = arith.constant 0 : index
    %c0_1 = arith.constant 0 : index
    %0 = vector.load %arg1[%c0, %c0_0, %c0_1] : memref<2x8x32xf32, #tpu.memory_space<vmem>>, vector<2x8x32xf32>
    %c0_2 = arith.constant 0 : index
    %c0_3 = arith.constant 0 : index
    %c0_4 = arith.constant 0 : index
    %1 = vector.load %arg2[%c0_2, %c0_3, %c0_4] : memref<2x8x128xf32, #tpu.memory_space<vmem>>, vector<2x8x128xf32>
    %2 = vector.shape_cast %0 : vector<2x8x32xf32> to vector<16x32xf32>
    %3 = vector.shape_cast %1 : vector<2x8x128xf32> to vector<16x128xf32>
    %c0_5 = arith.constant 0 : index
    %c0_6 = arith.constant 0 : index
    %4 = vector.load %arg3[%c0_5, %c0_6] : memref<32x16xf32, #tpu.memory_space<vmem>>, vector<32x16xf32>
    %c0_7 = arith.constant 0 : index
    %c0_8 = arith.constant 0 : index
    %5 = vector.load %arg4[%c0_7, %c0_8] : memref<1x16xf32, #tpu.memory_space<vmem>>, vector<1x16xf32>
    %cst = arith.constant dense<0.000000e+00> : vector<16x16xf32>
    %6 = tpu.matmul %2, %4, %cst {dimension_numbers = #tpu.dot_dimension_numbers<[1], [0], [0], [1], [0, 0, 1, 1], [], []>} : vector<16x32xf32>, vector<32x16xf32>, vector<16x16xf32> -> vector<16x16xf32>
    %7 = vector.broadcast %5 : vector<1x16xf32> to vector<16x16xf32>
    %8 = arith.addf %6, %7 : vector<16x16xf32>
    %9 = vector.shape_cast %8 : vector<16x16xf32> to vector<2x8x16xf32>
    %10 = vector.extract_strided_slice %9 {offsets = [0, 0, 0], sizes = [2, 1, 16], strides = [1, 1, 1]} : vector<2x8x16xf32> to vector<2x1x16xf32>
    %11 = vector.shape_cast %10 : vector<2x1x16xf32> to vector<2x16xf32>
    %12 = vector.extract_strided_slice %9 {offsets = [0, 1, 0], sizes = [2, 1, 16], strides = [1, 1, 1]} : vector<2x8x16xf32> to vector<2x1x16xf32>
    %13 = vector.shape_cast %12 : vector<2x1x16xf32> to vector<2x16xf32>
    %14 = vector.extract_strided_slice %9 {offsets = [0, 2, 0], sizes = [2, 1, 16], strides = [1, 1, 1]} : vector<2x8x16xf32> to vector<2x1x16xf32>
    %15 = vector.shape_cast %14 : vector<2x1x16xf32> to vector<2x16xf32>
    %16 = vector.extract_strided_slice %9 {offsets = [0, 3, 0], sizes = [2, 1, 16], strides = [1, 1, 1]} : vector<2x8x16xf32> to vector<2x1x16xf32>
    %17 = vector.shape_cast %16 : vector<2x1x16xf32> to vector<2x16xf32>
    %18 = vector.extract_strided_slice %9 {offsets = [0, 4, 0], sizes = [2, 1, 16], strides = [1, 1, 1]} : vector<2x8x16xf32> to vector<2x1x16xf32>
    %19 = vector.shape_cast %18 : vector<2x1x16xf32> to vector<2x16xf32>
    %20 = vector.extract_strided_slice %9 {offsets = [0, 5, 0], sizes = [2, 1, 16], strides = [1, 1, 1]} : vector<2x8x16xf32> to vector<2x1x16xf32>
    %21 = vector.shape_cast %20 : vector<2x1x16xf32> to vector<2x16xf32>
    %22 = vector.extract_strided_slice %9 {offsets = [0, 6, 0], sizes = [2, 1, 16], strides = [1, 1, 1]} : vector<2x8x16xf32> to vector<2x1x16xf32>
    %23 = vector.shape_cast %22 : vector<2x1x16xf32> to vector<2x16xf32>
    %24 = vector.extract_strided_slice %9 {offsets = [0, 7, 0], sizes = [2, 1, 16], strides = [1, 1, 1]} : vector<2x8x16xf32> to vector<2x1x16xf32>
    %25 = vector.shape_cast %24 : vector<2x1x16xf32> to vector<2x16xf32>
    %26 = tpu.concatenate %11, %13, %15, %17, %19, %21, %23, %25 in 1 : vector<2x16xf32>, vector<2x16xf32>, vector<2x16xf32>, vector<2x16xf32>, vector<2x16xf32>, vector<2x16xf32>, vector<2x16xf32>, vector<2x16xf32> -> vector<2x128xf32>
    %27 = vector.shape_cast %26 : vector<2x128xf32> to vector<2x1x128xf32>
    %28 = vector.broadcast %27 : vector<2x1x128xf32> to vector<2x8x128xf32>
    %29 = arith.mulf %28, %1 : vector<2x8x128xf32>
    %30 = vector.shape_cast %29 : vector<2x8x128xf32> to vector<16x128xf32>
    %c0_9 = arith.constant 0 : index
    %c0_10 = arith.constant 0 : index
    %31 = vector.load %arg5[%c0_9, %c0_10] : memref<128x16xf32, #tpu.memory_space<vmem>>, vector<128x16xf32>
    %cst_11 = arith.constant dense<0.000000e+00> : vector<16x16xf32>
    %32 = tpu.matmul %30, %31, %cst_11 {dimension_numbers = #tpu.dot_dimension_numbers<[1], [0], [0], [1], [0, 0, 1, 1], [], []>} : vector<16x128xf32>, vector<128x16xf32>, vector<16x16xf32> -> vector<16x16xf32>
    %c0_12 = arith.constant 0 : index
    %c0_13 = arith.constant 0 : index
    %33 = vector.load %arg6[%c0_12, %c0_13] : memref<1x16xf32, #tpu.memory_space<vmem>>, vector<1x16xf32>
    %34 = vector.broadcast %33 : vector<1x16xf32> to vector<16x16xf32>
    %35 = arith.addf %32, %34 : vector<16x16xf32>
    %c0_14 = arith.constant 0 : index
    %c0_15 = arith.constant 0 : index
    %36 = vector.load %arg7[%c0_14, %c0_15] : memref<32x32xf32, #tpu.memory_space<vmem>>, vector<32x32xf32>
    %cst_16 = arith.constant dense<0.000000e+00> : vector<16x32xf32>
    %37 = tpu.matmul %2, %36, %cst_16 {dimension_numbers = #tpu.dot_dimension_numbers<[1], [0], [0], [1], [0, 0, 1, 1], [], []>} : vector<16x32xf32>, vector<32x32xf32>, vector<16x32xf32> -> vector<16x32xf32>
    %c0_17 = arith.constant 0 : index
    %c0_18 = arith.constant 0 : index
    %38 = vector.load %arg8[%c0_17, %c0_18] : memref<16x32xf32, #tpu.memory_space<vmem>>, vector<16x32xf32>
    %cst_19 = arith.constant dense<0.000000e+00> : vector<16x32xf32>
    %39 = tpu.matmul %35, %38, %cst_19 {dimension_numbers = #tpu.dot_dimension_numbers<[1], [0], [0], [1], [0, 0, 1, 1], [], []>} : vector<16x16xf32>, vector<16x32xf32>, vector<16x32xf32> -> vector<16x32xf32>
    %40 = arith.addf %37, %39 : vector<16x32xf32>
    %c0_20 = arith.constant 0 : index
    %c0_21 = arith.constant 0 : index
    %41 = vector.load %arg9[%c0_20, %c0_21] : memref<1x32xf32, #tpu.memory_space<vmem>>, vector<1x32xf32>
    %42 = vector.broadcast %41 : vector<1x32xf32> to vector<16x32xf32>
    %43 = arith.addf %40, %42 : vector<16x32xf32>
    %44 = arith.addf %2, %43 : vector<16x32xf32>
    %cst_22 = arith.constant dense<0.000000e+00> : vector<16x16xf32>
    %45 = tpu.matmul %44, %4, %cst_22 {dimension_numbers = #tpu.dot_dimension_numbers<[1], [0], [0], [1], [0, 0, 1, 1], [], []>} : vector<16x32xf32>, vector<32x16xf32>, vector<16x16xf32> -> vector<16x16xf32>
    %46 = vector.broadcast %5 : vector<1x16xf32> to vector<16x16xf32>
    %47 = arith.addf %45, %46 : vector<16x16xf32>
    %c0_23 = arith.constant 0 : index
    %c0_24 = arith.constant 0 : index
    %48 = vector.load %arg10[%c0_23, %c0_24] : memref<16x128xf32, #tpu.memory_space<vmem>>, vector<16x128xf32>
    %cst_25 = arith.constant dense<0.000000e+00> : vector<16x128xf32>
    %49 = tpu.matmul %47, %48, %cst_25 {dimension_numbers = #tpu.dot_dimension_numbers<[1], [0], [0], [1], [0, 0, 1, 1], [], []>} : vector<16x16xf32>, vector<16x128xf32>, vector<16x128xf32> -> vector<16x128xf32>
    %c0_26 = arith.constant 0 : index
    %c0_27 = arith.constant 0 : index
    %50 = vector.load %arg13[%c0_26, %c0_27] : memref<1x128xf32, #tpu.memory_space<vmem>>, vector<1x128xf32>
    %51 = vector.broadcast %50 : vector<1x128xf32> to vector<16x128xf32>
    %52 = arith.addf %49, %51 : vector<16x128xf32>
    %c0_28 = arith.constant 0 : index
    %c0_29 = arith.constant 0 : index
    %53 = vector.load %arg11[%c0_28, %c0_29] : memref<16x16xf32, #tpu.memory_space<vmem>>, vector<16x16xf32>
    %cst_30 = arith.constant dense<0.000000e+00> : vector<16x16xf32>
    %54 = tpu.matmul %47, %53, %cst_30 {dimension_numbers = #tpu.dot_dimension_numbers<[1], [0], [0], [1], [0, 0, 1, 1], [], []>} : vector<16x16xf32>, vector<16x16xf32>, vector<16x16xf32> -> vector<16x16xf32>
    %55 = vector.shape_cast %54 : vector<16x16xf32> to vector<2x8x16xf32>
    %56 = vector.extract_strided_slice %55 {offsets = [0, 0, 0], sizes = [2, 1, 16], strides = [1, 1, 1]} : vector<2x8x16xf32> to vector<2x1x16xf32>
    %57 = vector.shape_cast %56 : vector<2x1x16xf32> to vector<2x16xf32>
    %58 = vector.extract_strided_slice %55 {offsets = [0, 1, 0], sizes = [2, 1, 16], strides = [1, 1, 1]} : vector<2x8x16xf32> to vector<2x1x16xf32>
    %59 = vector.shape_cast %58 : vector<2x1x16xf32> to vector<2x16xf32>
    %60 = vector.extract_strided_slice %55 {offsets = [0, 2, 0], sizes = [2, 1, 16], strides = [1, 1, 1]} : vector<2x8x16xf32> to vector<2x1x16xf32>
    %61 = vector.shape_cast %60 : vector<2x1x16xf32> to vector<2x16xf32>
    %62 = vector.extract_strided_slice %55 {offsets = [0, 3, 0], sizes = [2, 1, 16], strides = [1, 1, 1]} : vector<2x8x16xf32> to vector<2x1x16xf32>
    %63 = vector.shape_cast %62 : vector<2x1x16xf32> to vector<2x16xf32>
    %64 = vector.extract_strided_slice %55 {offsets = [0, 4, 0], sizes = [2, 1, 16], strides = [1, 1, 1]} : vector<2x8x16xf32> to vector<2x1x16xf32>
    %65 = vector.shape_cast %64 : vector<2x1x16xf32> to vector<2x16xf32>
    %66 = vector.extract_strided_slice %55 {offsets = [0, 5, 0], sizes = [2, 1, 16], strides = [1, 1, 1]} : vector<2x8x16xf32> to vector<2x1x16xf32>
    %67 = vector.shape_cast %66 : vector<2x1x16xf32> to vector<2x16xf32>
    %68 = vector.extract_strided_slice %55 {offsets = [0, 6, 0], sizes = [2, 1, 16], strides = [1, 1, 1]} : vector<2x8x16xf32> to vector<2x1x16xf32>
    %69 = vector.shape_cast %68 : vector<2x1x16xf32> to vector<2x16xf32>
    %70 = vector.extract_strided_slice %55 {offsets = [0, 7, 0], sizes = [2, 1, 16], strides = [1, 1, 1]} : vector<2x8x16xf32> to vector<2x1x16xf32>
    %71 = vector.shape_cast %70 : vector<2x1x16xf32> to vector<2x16xf32>
    %72 = tpu.concatenate %57, %59, %61, %63, %65, %67, %69, %71 in 1 : vector<2x16xf32>, vector<2x16xf32>, vector<2x16xf32>, vector<2x16xf32>, vector<2x16xf32>, vector<2x16xf32>, vector<2x16xf32>, vector<2x16xf32> -> vector<2x128xf32>
    %73 = vector.shape_cast %72 : vector<2x128xf32> to vector<2x1x128xf32>
    %c0_31 = arith.constant 0 : index
    %c0_32 = arith.constant 0 : index
    %74 = vector.load %arg12[%c0_31, %c0_32] : memref<128x128xf32, #tpu.memory_space<vmem>>, vector<128x128xf32>
    %cst_33 = arith.constant dense<0.000000e+00> : vector<16x128xf32>
    %75 = tpu.matmul %3, %74, %cst_33 {dimension_numbers = #tpu.dot_dimension_numbers<[1], [0], [0], [1], [0, 0, 1, 1], [], []>} : vector<16x128xf32>, vector<128x128xf32>, vector<16x128xf32> -> vector<16x128xf32>
    %76 = vector.shape_cast %75 : vector<16x128xf32> to vector<2x8x128xf32>
    %77 = vector.shape_cast %52 : vector<16x128xf32> to vector<2x8x128xf32>
    %78 = arith.addf %76, %77 : vector<2x8x128xf32>
    %79 = vector.broadcast %73 : vector<2x1x128xf32> to vector<2x8x128xf32>
    %80 = arith.addf %78, %79 : vector<2x8x128xf32>
    %cst_34 = arith.constant 0.000000e+00 : f32
    %81 = vector.broadcast %cst_34 : f32 to vector<2x8x128xf32>
    %82 = arith.cmpf ogt, %1, %81 : vector<2x8x128xf32>
    %cst_35 = arith.constant 2.000000e-01 : f32
    %83 = vector.broadcast %cst_35 : f32 to vector<2x8x128xf32>
    %84 = arith.mulf %83, %80 : vector<2x8x128xf32>
    %85 = arith.addf %1, %84 : vector<2x8x128xf32>
    %86 = arith.select %82, %85, %1 : vector<2x8x128xi1>, vector<2x8x128xf32>
    %c0_36 = arith.constant 0 : index
    %c0_37 = arith.constant 0 : index
    %c0_38 = arith.constant 0 : index
    %87 = vector.load %arg15[%c0_36, %c0_37, %c0_38] : memref<2x8x128xf32, #tpu.memory_space<vmem>>, vector<2x8x128xf32>
    tpu.vector_store %arg15[%c0_36, %c0_37, %c0_38], %86 {strides = array<i32>} : memref<2x8x128xf32, #tpu.memory_space<vmem>>, vector<2x8x128xf32>,
    %88 = vector.shape_cast %44 : vector<16x32xf32> to vector<2x8x32xf32>
    %c0_39 = arith.constant 0 : index
    %c0_40 = arith.constant 0 : index
    %c0_41 = arith.constant 0 : index
    %89 = vector.load %arg14[%c0_39, %c0_40, %c0_41] : memref<2x8x32xf32, #tpu.memory_space<vmem>>, vector<2x8x32xf32>
    tpu.vector_store %arg14[%c0_39, %c0_40, %c0_41], %88 {strides = array<i32>} : memref<2x8x32xf32, #tpu.memory_space<vmem>>, vector<2x8x32xf32>,
    return
  }
  func.func @transform_0(%arg0: i32) -> (i32, i32, i32) {
    %c0_i32 = arith.constant 0 : i32
    %c0_i32_0 = arith.constant 0 : i32
    %c0_i32_1 = arith.constant 0 : i32
    return %arg0, %c0_i32, %c0_i32_0 : i32, i32, i32
  }
  func.func @transform_1(%arg0: i32) -> (i32, i32, i32) {
    %c0_i32 = arith.constant 0 : i32
    %c0_i32_0 = arith.constant 0 : i32
    %c0_i32_1 = arith.constant 0 : i32
    return %arg0, %c0_i32, %c0_i32_0 : i32, i32, i32
  }
  func.func @transform_2(%arg0: i32) -> (i32, i32) {
    %c0_i32 = arith.constant 0 : i32
    %c0_i32_0 = arith.constant 0 : i32
    %c0_i32_1 = arith.constant 0 : i32
    return %c0_i32, %c0_i32_0 : i32, i32
  }
  func.func @transform_3(%arg0: i32) -> (i32, i32) {
    %c0_i32 = arith.constant 0 : i32
    %c0_i32_0 = arith.constant 0 : i32
    %c0_i32_1 = arith.constant 0 : i32
    return %c0_i32, %c0_i32_0 : i32, i32
  }
  func.func @transform_4(%arg0: i32) -> (i32, i32) {
    %c0_i32 = arith.constant 0 : i32
    %c0_i32_0 = arith.constant 0 : i32
    %c0_i32_1 = arith.constant 0 : i32
    return %c0_i32, %c0_i32_0 : i32, i32
  }
  func.func @transform_5(%arg0: i32) -> (i32, i32) {
    %c0_i32 = arith.constant 0 : i32
    %c0_i32_0 = arith.constant 0 : i32
    %c0_i32_1 = arith.constant 0 : i32
    return %c0_i32, %c0_i32_0 : i32, i32
  }
  func.func @transform_6(%arg0: i32) -> (i32, i32) {
    %c0_i32 = arith.constant 0 : i32
    %c0_i32_0 = arith.constant 0 : i32
    %c0_i32_1 = arith.constant 0 : i32
    return %c0_i32, %c0_i32_0 : i32, i32
  }
  func.func @transform_7(%arg0: i32) -> (i32, i32) {
    %c0_i32 = arith.constant 0 : i32
    %c0_i32_0 = arith.constant 0 : i32
    %c0_i32_1 = arith.constant 0 : i32
    return %c0_i32, %c0_i32_0 : i32, i32
  }
  func.func @transform_8(%arg0: i32) -> (i32, i32) {
    %c0_i32 = arith.constant 0 : i32
    %c0_i32_0 = arith.constant 0 : i32
    %c0_i32_1 = arith.constant 0 : i32
    return %c0_i32, %c0_i32_0 : i32, i32
  }
  func.func @transform_9(%arg0: i32) -> (i32, i32) {
    %c0_i32 = arith.constant 0 : i32
    %c0_i32_0 = arith.constant 0 : i32
    %c0_i32_1 = arith.constant 0 : i32
    return %c0_i32, %c0_i32_0 : i32, i32
  }
  func.func @transform_10(%arg0: i32) -> (i32, i32) {
    %c0_i32 = arith.constant 0 : i32
    %c0_i32_0 = arith.constant 0 : i32
    %c0_i32_1 = arith.constant 0 : i32
    return %c0_i32, %c0_i32_0 : i32, i32
  }
  func.func @transform_11(%arg0: i32) -> (i32, i32) {
    %c0_i32 = arith.constant 0 : i32
    %c0_i32_0 = arith.constant 0 : i32
    %c0_i32_1 = arith.constant 0 : i32
    return %c0_i32, %c0_i32_0 : i32, i32
  }
  func.func @transform_12(%arg0: i32) -> (i32, i32) {
    %c0_i32 = arith.constant 0 : i32
    %c0_i32_0 = arith.constant 0 : i32
    %c0_i32_1 = arith.constant 0 : i32
    return %c0_i32, %c0_i32_0 : i32, i32
  }
  func.func @transform_13(%arg0: i32) -> (i32, i32, i32) {
    %c0_i32 = arith.constant 0 : i32
    %c0_i32_0 = arith.constant 0 : i32
    %c0_i32_1 = arith.constant 0 : i32
    return %arg0, %c0_i32, %c0_i32_0 : i32, i32, i32
  }
  func.func @transform_14(%arg0: i32) -> (i32, i32, i32) {
    %c0_i32 = arith.constant 0 : i32
    %c0_i32_0 = arith.constant 0 : i32
    %c0_i32_1 = arith.constant 0 : i32
    return %arg0, %c0_i32, %c0_i32_0 : i32, i32, i32
  }
}

</mosaic_0001>

<bundles_post_ra>
// kernel: tile.19
= control target key start
LH: loop header
LB: loop body
LE: loop exit
PB: predicated region body
PF: predicated region fallthrough
CT: control target
= control target key end

     0   :  { %vm4_vm0 = vcmask 1047556   ;;  %s209_s14 = smov 96   ;;  %s210_s19 = smov 112   ;;  %vm6_vm1 = vcmask 130048   ;;  %vm25_vm2 = vcmask 1048448   ;;  %vm46_vm3 = vcmask 917248   ;;  %s388_s0 = inlined_call_operand.vmem [shape: f32[16,8,16], index: 0, kind: input, shape index: {}]   ;;  %s389_s1 = inlined_call_operand.vmem [shape: f32[16,128], index: 1, kind: output, shape index: {}]  }
   0x1   :  { %v172_v0 = vld [vmem:[%s388_s0 + $0x6] ss:$8 sm:$0xf]   ;;  %v167_v3 = vld [vmem:[%s388_s0 + $0x7] ss:$8 sm:$0xf]  }
   0x2   :  { %v173_v1 = vld [vmem:[%s388_s0 + $0x6] ss:$8 sm:$0xf0]   ;;  %v168_v4 = vld [vmem:[%s388_s0 + $0x7] ss:$8 sm:$0xf0]  }
   0x3   :  { %v43_v2 = vsel %vm4_vm0, %v173_v1, %v172_v0  ;;  %v22_v5 = vsel %vm4_vm0, %v168_v4, %v167_v3  ;;  %v174_v6 = vld [vmem:[%s388_s0 + $0x46] ss:$8 sm:$0xf]   ;;  %v169_v9 = vld [vmem:[%s388_s0 + $0x47] ss:$8 sm:$0xf]  }
   0x4   :  { %44 = vrot.lane.b32.xlu1 %v43_v2, %s209_s14  ;;  %v175_v7 = vld [vmem:[%s388_s0 + $0x46] ss:$8 sm:$0xf0]   ;;  %23 = vrot.lane.b32.xlu0 %v22_v5, %s210_s19  ;;  %v170_v10 = vld [vmem:[%s388_s0 + $0x47] ss:$8 sm:$0xf0]  }
   0x5   :  { %v53_v8 = vsel %vm4_vm0, %v175_v7, %v174_v6  ;;  %v32_v11 = vsel %vm4_vm0, %v170_v10, %v169_v9  ;;  %v179_v12 = vld [vmem:[%s388_s0 + $0x45] ss:$8 sm:$0xf]   ;;  %v184_v18 = vld [vmem:[%s388_s0 + $0x44] ss:$8 sm:$0xf]  }
   0x6   :  { %v180_v13 = vld [vmem:[%s388_s0 + $0x45] ss:$8 sm:$0xf0]   ;;  %v185_v19 = vld [vmem:[%s388_s0 + $0x44] ss:$8 sm:$0xf0]  }
   0x7   :  { %v177_v14 = vld [vmem:[%s388_s0 + $0x5] ss:$8 sm:$0xf]   ;;  %v74_v16 = vsel %vm4_vm0, %v180_v13, %v179_v12  ;;  %v182_v20 = vld [vmem:[%s388_s0 + $0x4] ss:$8 sm:$0xf]   ;;  %v95_v22 = vsel %vm4_vm0, %v185_v19, %v184_v18 }
   0x8   :  { %54 = vrot.lane.b32.xlu1 %v53_v8, %s209_s14  ;;  %v178_v15 = vld [vmem:[%s388_s0 + $0x5] ss:$8 sm:$0xf0]   ;;  %33 = vrot.lane.b32.xlu0 %v32_v11, %s210_s19  ;;  %v183_v21 = vld [vmem:[%s388_s0 + $0x4] ss:$8 sm:$0xf0]  }
   0x9   :  { %v64_v17 = vsel %vm4_vm0, %v178_v15, %v177_v14  ;;  %s211_s11 = smov 80   ;;  %v85_v23 = vsel %vm4_vm0, %v183_v21, %v182_v20  ;;  %v189_v24 = vld [vmem:[%s388_s0 + $0x43] ss:$8 sm:$0xf]   ;;  %s212_s20 = smov 64   ;;  %vm67_vm4 = vcmask 786048  }
   0xa   :  { %v190_v25 = vld [vmem:[%s388_s0 + $0x43] ss:$8 sm:$0xf0]   ;;  %v194_v28 = vld [vmem:[%s388_s0 + $0x42] ss:$8 sm:$0xf]  }
   0xb   :  { %v187_v26 = vld [vmem:[%s388_s0 + $0x3] ss:$8 sm:$0xf]   ;;  %v195_v29 = vld [vmem:[%s388_s0 + $0x42] ss:$8 sm:$0xf0]   ;;  %v116_v30 = vsel %vm4_vm0, %v190_v25, %v189_v24 }
   0xc   :  { %75 = vrot.lane.b32.xlu1 %v74_v16, %s211_s11  ;;  %65 = vrot.lane.b32.xlu0 %v64_v17, %s211_s11  ;;  %v188_v27 = vld [vmem:[%s388_s0 + $0x3] ss:$8 sm:$0xf0]   ;;  %v192_v31 = vld [vmem:[%s388_s0 + $0x2] ss:$8 sm:$0xf]   ;;  %v137_v40 = vsel %vm4_vm0, %v195_v29, %v194_v28 }
   0xd   :  { %v2_v32 = vld [vmem:[%s388_s0] ss:$8 sm:$0xf]   ;;  %v106_v33 = vsel %vm4_vm0, %v188_v27, %v187_v26  ;;  %v193_v36 = vld [vmem:[%s388_s0 + $0x2] ss:$8 sm:$0xf0]  }
   0xe   :  { %v3_v34 = vld [vmem:[%s388_s0] ss:$8 sm:$0xf0]   ;;  %s213_s8 = smov 48   ;;  %v127_v41 = vsel %vm4_vm0, %v193_v36, %v192_v31  ;;  %s215_s21 = smov 16   ;;  %vm88_vm5 = vcmask 654848  }
   0xf   :  { %v164_v35 = vld [vmem:[%s388_s0 + $0x40] ss:$8 sm:$0xf]   ;;  %v5_v37 = vsel %vm4_vm0, %v3_v34, %v2_v32  ;;  %v199_v42 = vld [vmem:[%s388_s0 + $0x41] ss:$8 sm:$0xf]  }
  0x10   :  { %96 = vrot.lane.b32.xlu1 %v95_v22, %s212_s20  ;;  %86 = vrot.lane.b32.xlu0 %v85_v23, %s212_s20  ;;  %v165_v38 = vld [vmem:[%s388_s0 + $0x40] ss:$8 sm:$0xf0]   ;;  %7 = vst.msk [vmem:[%s389_s1] sm:$0xff] %vm6_vm1, %v5_v37   ;;  %vm109_vm6 = vcmask 523648   ;;  %vm130_vm7 = vcmask 392448  }
  0x11   :  { %v13_v39 = vsel %vm4_vm0, %v165_v38, %v164_v35  ;;  %v200_v43 = vld [vmem:[%s388_s0 + $0x41] ss:$8 sm:$0xf0]   ;;  %vm151_vm8 = vcmask 261248  }
  0x12   :  { %166 = vst.msk [vmem:[%s389_s1 + $0x8] sm:$0xff] %vm6_vm1, %v13_v39   ;;  %v197_v44 = vld [vmem:[%s388_s0 + $0x1] ss:$8 sm:$0xf]   ;;  %v158_v46 = vsel %vm4_vm0, %v200_v43, %v199_v42 }
  0x13   :  { %v198_v45 = vld [vmem:[%s388_s0 + $0x1] ss:$8 sm:$0xf0]   ;;  %s214_s0 = smov 32  }
  0x14   :  { %117 = vrot.lane.b32.xlu1 %v116_v30, %s213_s8  ;;  %107 = vrot.lane.b32.xlu0 %v106_v33, %s213_s8  ;;  %v148_v47 = vsel %vm4_vm0, %v198_v45, %v197_v44 }
  0x18   :  { %138 = vrot.lane.b32.xlu1 %v137_v40, %s214_s0  ;;  %128 = vrot.lane.b32.xlu0 %v127_v41, %s214_s0 }
  0x1c   :  { %159 = vrot.lane.b32.xlu1 %v158_v46, %s215_s21  ;;  %149 = vrot.lane.b32.xlu0 %v148_v47, %s215_s21 }
  0x76   :  { %v45_v48 = vpop.permute.xlu1 %44   ;;  %v24_v49 = vpop.permute.xlu0 %23  }
  0x77   :  { %26 = vst.msk [vmem:[%s389_s1] sm:$0xff] %vm25_vm2, %v24_v49  }
  0x78   :  { %47 = vst.msk [vmem:[%s389_s1] sm:$0xff] %vm46_vm3, %v45_v48  }
  0x7a   :  { %v55_v50 = vpop.permute.xlu1 %54   ;;  %v34_v51 = vpop.permute.xlu0 %33  }
  0x7b   :  { %171 = vst.msk [vmem:[%s389_s1 + $0x8] sm:$0xff] %vm25_vm2, %v34_v51  }
  0x7c   :  { %176 = vst.msk [vmem:[%s389_s1 + $0x8] sm:$0xff] %vm46_vm3, %v55_v50  }
  0x7e   :  { %v76_v52 = vpop.permute.xlu1 %75   ;;  %v66_v53 = vpop.permute.xlu0 %65  }
  0x7f   :  { %181 = vst.msk [vmem:[%s389_s1 + $0x8] sm:$0xff] %vm67_vm4, %v76_v52   ;;  %68 = vst.msk [vmem:[%s389_s1] sm:$0xff] %vm67_vm4, %v66_v53  }
  0x82   :  { %v97_v54 = vpop.permute.xlu1 %96   ;;  %v87_v55 = vpop.permute.xlu0 %86  }
  0x83   :  { %186 = vst.msk [vmem:[%s389_s1 + $0x8] sm:$0xff] %vm88_vm5, %v97_v54   ;;  %89 = vst.msk [vmem:[%s389_s1] sm:$0xff] %vm88_vm5, %v87_v55  }
  0x86   :  { %v118_v56 = vpop.permute.xlu1 %117   ;;  %v108_v57 = vpop.permute.xlu0 %107  }
  0x87   :  { %191 = vst.msk [vmem:[%s389_s1 + $0x8] sm:$0xff] %vm109_vm6, %v118_v56   ;;  %110 = vst.msk [vmem:[%s389_s1] sm:$0xff] %vm109_vm6, %v108_v57  }
  0x8a   :  { %v139_v58 = vpop.permute.xlu1 %138   ;;  %v129_v59 = vpop.permute.xlu0 %128  }
  0x8b   :  { %196 = vst.msk [vmem:[%s389_s1 + $0x8] sm:$0xff] %vm130_vm7, %v139_v58   ;;  %131 = vst.msk [vmem:[%s389_s1] sm:$0xff] %vm130_vm7, %v129_v59  }
  0x8e   :  { %v160_v60 = vpop.permute.xlu1 %159   ;;  %v150_v61 = vpop.permute.xlu0 %149  }
  0x8f   :  { %201 = vst.msk [vmem:[%s389_s1 + $0x8] sm:$0xff] %vm151_vm8, %v160_v60   ;;  %152 = vst.msk [vmem:[%s389_s1] sm:$0xff] %vm151_vm8, %v150_v61  }

// kernel: _lambda_.1
= control target key start
LH: loop header
LB: loop body
LE: loop exit
PB: predicated region body
PF: predicated region fallthrough
CT: control target
= control target key end

     0   :  { %vm62_vm0 = vcmask 261120   ;;  %s1596_s0 = inlined_call_operand.vmem [shape: f32[2,8,32], index: 0, kind: input, shape index: {}]   ;;  %s1597_s1 = inlined_call_operand.vmem [shape: f32[2,8,128], index: 1, kind: input, shape index: {}, may-alias: {1,14}]   ;;  %s1598_s2 = inlined_call_operand.vmem [shape: f32[32,16], index: 2, kind: input, shape index: {}]   ;;  %s1599_s3 = inlined_call_operand.vmem [shape: f32[1,16], index: 3, kind: input, shape index: {}]   ;;  %s1600_s4 = inlined_call_operand.vmem [shape: f32[128,16], index: 4, kind: input, shape index: {}]   ;;  %s1601_s5 = inlined_call_operand.vmem [shape: f32[1,16], index: 5, kind: input, shape index: {}]   ;;  %s1602_s6 = inlined_call_operand.vmem [shape: f32[32,32], index: 6, kind: input, shape index: {}]   ;;  %s1603_s7 = inlined_call_operand.vmem [shape: f32[16,32], index: 7, kind: input, shape index: {}]   ;;  %s1604_s8 = inlined_call_operand.vmem [shape: f32[1,32], index: 8, kind: input, shape index: {}]   ;;  %s1605_s9 = inlined_call_operand.vmem [shape: f32[16,128], index: 9, kind: input, shape index: {}]   ;;  %s1606_s10 = inlined_call_operand.vmem [shape: f32[16,16], index: 10, kind: input, shape index: {}]   ;;  %s1607_s11 = inlined_call_operand.vmem [shape: f32[128,128], index: 11, kind: input, shape index: {}]   ;;  %s1608_s12 = inlined_call_operand.vmem [shape: f32[1,128], index: 12, kind: input, shape index: {}]   ;;  %s1609_s13 = inlined_call_operand.hbm [shape: f32[2,8,32], index: 13, kind: output, shape index: {0}]   ;;  %s1610_s14 = inlined_call_operand.vmem [shape: f32[2,8,128], index: 14, kind: output, shape index: {1}, may-alias: {1,14}]  }
   0x1   :  { %v1299_v0 = vld [vmem:[%s1598_s2 + $0x18] sm:$0xff]  ;;  %v1304_v1 = vld [vmem:[%s1598_s2 + $0x10] sm:$0xff]  ;;  %v1310_v2 = vld [vmem:[%s1596_s0] sm:$0xff] }
   0x2   :  { %1053 = vmatprep.subr.mxu0 %v1299_v0  ;;  %v1316_v3 = vld [vmem:[%s1598_s2 + $0x8] sm:$0xff]  ;;  %1061 = vmatprep.mubr.msk.f32.mxu0 %vm62_vm0, %v1310_v2 }
   0x3   :  { %1054 = vmatpush3.msra.mxu0 %v1299_v0 }
   0x4   :  { %20 = vsyncpa [#allocation3], 0  ;;  %1055 = vmatprep.subr.mxu0 %v1304_v1  ;;  %v1325_v4 = vld [vmem:[%s1598_s2] sm:$0xff]  ;;  %v1332_v5 = vld [vmem:[%s1596_s0 + $0x8] sm:$0xff]  ;;  %vm147_vm1 = vcmask 1041409   ;;  %s1210_s0 = smov 48   ;;  %v208_v53 = vlaneseq }
   0x5   :  { %1056 = vmatpush3.msra.mxu0 %v1304_v1  ;;  %v254_v6 = vld [vmem:[%s1600_s4 + $0x78] sm:$0xff]  ;;  %v253_v7 = vld [vmem:[%s1600_s4 + $0x70] sm:$0xff]  ;;  %v252_v8 = vld [vmem:[%s1600_s4 + $0x68] sm:$0xff]  ;;  %s1211_s29 = smov 16   ;;  %s1212_s18 = smov 64   ;;  %vm191_vm2 = vcmask 130048  }
   0x6   :  { %1057 = vmatprep.subr.mxu0 %v1316_v3  ;;  %1064 = vmatprep.subr.mxu1 %v254_v6  ;;  %v251_v9 = vld [vmem:[%s1600_s4 + $0x60] sm:$0xff]  ;;  %v250_v10 = vld [vmem:[%s1600_s4 + $0x58] sm:$0xff]  ;;  %v249_v11 = vld [vmem:[%s1600_s4 + $0x50] sm:$0xff]  ;;  %s1213_s19 = smov 32   ;;  %s1214_s24 = smov 96   ;;  %vm194_vm3 = vcmask 392192  }
   0x7   :  { %1058 = vmatpush3.msra.mxu0 %v1316_v3  ;;  %1065 = vmatpush3.msra.mxu1 %v254_v6  ;;  %v248_v12 = vld [vmem:[%s1600_s4 + $0x48] sm:$0xff]  ;;  %v1362_v13 = vld [vmem:[%s1599_s3] ss:$0 sm:$0xff]  ;;  %v246_v16 = vld [vmem:[%s1600_s4 + $0x38] sm:$0xff]  ;;  %s1215_s25 = smov 80   ;;  %s1216_s2 = smov 112  }
   0x8   :  { %1059 = vmatprep.subr.mxu0 %v1325_v4  ;;  %1066 = vmatprep.subr.mxu1 %v253_v7  ;;  %v247_v15 = vld [vmem:[%s1600_s4 + $0x40] sm:$0xff]  ;;  %v245_v20 = vld [vmem:[%s1600_s4 + $0x30] sm:$0xff]  ;;  %v244_v22 = vld [vmem:[%s1600_s4 + $0x28] sm:$0xff]  ;;  %v1217_v51 = vmov 1966171168   ;;  %vm196_vm4 = vcmask 523264  }
   0x9   :  { %1060 = vmatpush3.msra.mxu0 %v1325_v4  ;;  %1067 = vmatpush3.msra.mxu1 %v253_v7  ;;  %v243_v31 = vld [vmem:[%s1600_s4 + $0x20] sm:$0xff]  ;;  %v242_v34 = vld [vmem:[%s1600_s4 + $0x18] sm:$0xff]  ;;  %v241_v39 = vld [vmem:[%s1600_s4 + $0x10] sm:$0xff]  ;;  %v206_v52 = vunpack.c.l.s4 %v1217_v51  ;;  %vm198_vm5 = vcmask 654336   ;;  %v209_v60 = vshrl.u32 %v208_v53, 7  ;;  %vm200_vm6 = vcmask 785408  }
   0xa   :  { %1062 = vmatmul.mubr.msk.f32.vlgmr.msra.gmra.mxu0 %vm62_vm0, %v1332_v5  ;;  %1068 = vmatprep.subr.mxu1 %v252_v8  ;;  %v240_v45 = vld [vmem:[%s1600_s4 + $0x8] sm:$0xff]  ;;  %v239_v47 = vld [vmem:[%s1600_s4] sm:$0xff]  ;;  %vm202_vm7 = vcmask 916480   ;;  %v837_v53 = vld [vmem:[%s1607_s11 + $0x18] sm:$0xff] }
   0xb   :  { %1069 = vmatpush3.msra.mxu1 %v252_v8  ;;  %v207_v59 = vunpack.c.0.s8 %v206_v52 }
   0xc   :  { %1070 = vmatprep.subr.mxu1 %v251_v9 }
   0xd   :  { %1071 = vmatpush3.msra.mxu1 %v251_v9  ;;  %v1413_v7 = vsub.s32 %v207_v59, %v209_v60 }
   0xe   :  { %1072 = vmatprep.subr.mxu1 %v250_v10 }
   0xf   :  { %1073 = vmatpush3.msra.mxu1 %v250_v10 }
  0x10   :  { %1074 = vmatprep.subr.mxu1 %v249_v11 }
  0x11   :  { %1075 = vmatpush3.msra.mxu1 %v249_v11 }
  0x12   :  { %1076 = vmatprep.subr.mxu1 %v248_v12 }
  0x13   :  { %1077 = vmatpush3.msra.mxu1 %v248_v12  ;;  %v1418_v12 = vsub.s32 0, %v209_v60 }
  0x14   :  { %1078 = vmatprep.subr.mxu1 %v247_v15 }
  0x15   :  { %1079 = vmatpush3.msra.mxu1 %v247_v15 }
  0x16   :  { %1080 = vmatprep.subr.mxu1 %v246_v16 }
  0x17   :  { %1081 = vmatpush3.msra.mxu1 %v246_v16  ;;  %v1424_v16 = vld [vmem:[%s1597_s1] sm:$0xff] }
  0x18   :  { %1082 = vmatprep.subr.mxu1 %v245_v20 }
  0x19   :  { %1083 = vmatpush3.msra.mxu1 %v245_v20 }
  0x1a   :  { %1084 = vmatprep.subr.mxu1 %v244_v22 }
  0x1b   :  { %1085 = vmatpush3.msra.mxu1 %v244_v22 }
  0x1c   :  { %1086 = vmatprep.subr.mxu1 %v243_v31 }
  0x1d   :  { %1087 = vmatpush3.msra.mxu1 %v243_v31  ;;  %v339_v31 = vld [vmem:[%s1602_s6 + $0x10] sm:$0xff] }
  0x1e   :  { %1088 = vmatprep.subr.mxu1 %v242_v34 }
  0x1f   :  { %1089 = vmatpush3.msra.mxu1 %v242_v34  ;;  %v849_v34 = vld [vmem:[%s1607_s11 + $0x78] sm:$0xff] }
  0x20   :  { %1090 = vmatprep.subr.mxu1 %v241_v39 }
  0x21   :  { %1091 = vmatpush3.msra.mxu1 %v241_v39  ;;  %v840_v39 = vld [vmem:[%s1607_s11 + $0x30] sm:$0xff] }
  0x22   :  { %1092 = vmatprep.subr.mxu1 %v240_v45 }
  0x23   :  { %1093 = vmatpush3.msra.mxu1 %v240_v45  ;;  %v979_v45 = vld [vmem:[%s1604_s8] ss:$0 sm:$0xff] }
  0x24   :  { %1094 = vmatprep.subr.mxu1 %v239_v47 }
  0x25   :  { %1095 = vmatpush3.msra.mxu1 %v239_v47 }
  0x26   :  { %1142 = vmatprep.subr.mxu1 %v849_v34 }
  0xca   :  { %v1063_v14 = vpop.f32.mrf.mxu0 }
  0xcb   :  { %v141_v17 = vadd.f32 %v1063_v14, %v1362_v13 }
  0xcc   :  { %v135_v18 = vpop.f32.mrf.mxu0 }
  0xcd   :  { %v136_v19 = vadd.f32 %v1362_v13, %v135_v18  ;;  %v146_v21 = vrot.slane %v141_v17, 7  ;;  %v162_v24 = vrot.slane %v141_v17, 2  ;;  %v168_v32 = vrot.slane %v141_v17, 3 }
  0xce   :  { %v156_v33 = vrot.slane %v141_v17, 1  ;;  %v180_v40 = vrot.slane %v141_v17, 5  ;;  %v174_v41 = vrot.slane %v141_v17, 4  ;;  %v186_v46 = vrot.slane %v141_v17, 6 }
  0xcf   :  { %v161_v23 = vrot.slane %v136_v19, 3  ;;  %v150_v25 = vrot.slane %v136_v19, 1  ;;  %v148_v26 = vsel %vm147_vm1, %v146_v21, %v136_v19  ;;  %v167_v29 = vrot.slane %v136_v19, 4 }
  0xd0   :  { %v155_v30 = vrot.slane %v136_v19, 2  ;;  %v179_v37 = vrot.slane %v136_v19, 6  ;;  %v173_v38 = vrot.slane %v136_v19, 5  ;;  %v185_v44 = vrot.slane %v136_v19, 7  ;;  %v1431_v19 = vld [vmem:[%s1597_s1 + $0x8] sm:$0xff] }
  0xd1   :  { %v163_v27 = vsel %vm147_vm1, %v162_v24, %v161_v23  ;;  %v151_v28 = vsel %vm147_vm1, %v141_v17, %v150_v25  ;;  %v169_v35 = vsel %vm147_vm1, %v168_v32, %v167_v29  ;;  %v342_v23 = vld [vmem:[%s1603_s7 + $0x8] sm:$0xff]  ;;  %v341_v24 = vld [vmem:[%s1603_s7] sm:$0xff]  ;;  %v340_v25 = vld [vmem:[%s1602_s6 + $0x18] sm:$0xff] }
  0xd2   :  { %164 = vrot.lane.b32.xlu1 %v163_v27, %s1210_s0  ;;  %152 = vrot.lane.b32.xlu0 %v151_v28, %s1211_s29  ;;  %v157_v36 = vsel %vm147_vm1, %v156_v33, %v155_v30  ;;  %v181_v42 = vsel %vm147_vm1, %v180_v40, %v179_v37  ;;  %v175_v43 = vsel %vm147_vm1, %v174_v41, %v173_v38  ;;  %v974_v27 = vld [vmem:[%s1601_s5] ss:$0 sm:$0xff]  ;;  %v338_v32 = vld [vmem:[%s1602_s6 + $0x8] sm:$0xff] }
  0xd3   :  { %v187_v48 = vsel %vm147_vm1, %v186_v46, %v185_v44  ;;  %1099 = vmatprep.subr.mxu0 %v342_v23  ;;  %v337_v33 = vld [vmem:[%s1602_s6] sm:$0xff]  ;;  %v841_v38 = vld [vmem:[%s1607_s11 + $0x38] sm:$0xff]  ;;  %v839_v40 = vld [vmem:[%s1607_s11 + $0x28] sm:$0xff] }
  0xd4   :  { %1100 = vmatpush3.msra.mxu0 %v342_v23  ;;  %v842_v37 = vld [vmem:[%s1607_s11 + $0x40] sm:$0xff] }
  0xd5   :  { %1101 = vmatprep.subr.mxu0 %v341_v24  ;;  %v838_v41 = vld [vmem:[%s1607_s11 + $0x20] sm:$0xff] }
  0xd6   :  { %170 = vrot.lane.b32.xlu1 %v169_v35, %s1212_s18  ;;  %158 = vrot.lane.b32.xlu0 %v157_v36, %s1213_s19  ;;  %v844_v35 = vld [vmem:[%s1607_s11 + $0x50] sm:$0xff]  ;;  %v843_v36 = vld [vmem:[%s1607_s11 + $0x48] sm:$0xff] }
  0xd7   :  { %1102 = vmatpush3.msra.mxu0 %v341_v24 }
  0xd8   :  { %1106 = vmatprep.subr.mxu0 %v340_v25 }
  0xda   :  { %182 = vrot.lane.b32.xlu1 %v181_v42, %s1214_s24  ;;  %176 = vrot.lane.b32.xlu0 %v175_v43, %s1215_s25 }
  0xde   :  { %188 = vrot.lane.b32.xlu0 %v187_v48, %s1216_s2 }
 0x144   :  { %v165_v49 = vpop.permute.xlu1 %164  ;;  %v153_v50 = vpop.permute.xlu0 %152 }
 0x145   :  { %v192_v54 = vsel %vm191_vm2, %v148_v26, %v153_v50 }
 0x148   :  { %v171_v55 = vpop.permute.xlu1 %170  ;;  %v159_v56 = vpop.permute.xlu0 %158 }
 0x149   :  { %v193_v57 = vsel %vm62_vm0, %v192_v54, %v159_v56  ;;  %v591_v54 = vld [vmem:[%s1605_s9] sm:$0xff]  ;;  %v682_v56 = vld [vmem:[%s1606_s10 + $0x8] sm:$0xff] }
 0x14a   :  { %v195_v58 = vsel %vm194_vm3, %v193_v57, %v165_v49  ;;  %v834_v57 = vld [vmem:[%s1607_s11] sm:$0xff] }
 0x14b   :  { %v197_v61 = vsel %vm196_vm4, %v195_v58, %v171_v55  ;;  %v835_v55 = vld [vmem:[%s1607_s11 + $0x8] sm:$0xff] }
 0x14c   :  { %v177_v62 = vpop.permute.xlu0 %176  ;;  %v183_v63 = vpop.permute.xlu1 %182 }
 0x14d   :  { %v199_v6 = vsel %vm198_vm5, %v197_v61, %v177_v62  ;;  %v681_v62 = vld [vmem:[%s1606_s10] sm:$0xff]  ;;  %s1218_s10 = smov [#allocation2]  }
 0x14e   :  { %v201_v9 = vsel %vm200_vm6, %v199_v6, %v183_v63 }
 0x150   :  { %v189_v8 = vpop.permute.xlu0 %188 }
 0x151   :  { %v203_v10 = vsel %vm202_vm7, %v201_v9, %v189_v8 }
 0x152   :  { %v211_v11 = vrot.slane %v203_v10, %v1413_v7 }
 0x154   :  { %v212_v14 = vcombine.high %v211_v11, %v211_v11  ;;  %v219_v15 = vrot.slane %v211_v11, %v1413_v7 }
 0x156   :  { %v226_v17 = vrot.slane %v212_v14, %v1413_v7  ;;  %v230_v18 = vrot.slane %v219_v15, %v1418_v12 }
 0x158   :  { %v237_v20 = vmul.f32 %v230_v18, %v1424_v16  ;;  %v234_v21 = vrot.slane %v226_v17, %v1418_v12 }
 0x15a   :  { %1096 = vmatprep.mubr.f32.mxu1 %v237_v20  ;;  %v238_v22 = vmul.f32 %v234_v21, %v1431_v19 }
 0x15c   :  { %1097 = vmatmul.mubr.f32.vlgmr.msra.gmra.mxu1 %v238_v22 }
 0x15d   :  { %1174 = vmatprep.mubr.f32.mxu1 %v1424_v16  ;;  %1143 = vmatpush3.msra.mxu1 %v849_v34 }
 0x21c   :  { %v1098_v26 = vpop.f32.mrf.mxu1 }
 0x21d   :  { %v334_v30 = vadd.f32 %v1098_v26, %v974_v27 }
 0x21e   :  { %v328_v28 = vpop.f32.mrf.mxu1 }
 0x21f   :  { %v329_v29 = vadd.f32 %v974_v27, %v328_v28 }
 0x221   :  { %1103 = vmatprep.mubr.msk.f32.mxu0 %vm191_vm2, %v329_v29 }
 0x222   :  { %1104 = vmatmul.mubr.msk.f32.vlgmr.msra.gmra.mxu0 %vm191_vm2, %v334_v30 }
 0x223   :  { %1107 = vmatpush3.msra.mxu0 %v340_v25  ;;  %1114 = vmatprep.mubr.msk.f32.mxu0 %vm62_vm0, %v1310_v2 }
 0x224   :  { %1108 = vmatprep.subr.mxu0 %v339_v31 }
 0x225   :  { %1109 = vmatpush3.msra.mxu0 %v339_v31 }
 0x226   :  { %1110 = vmatprep.subr.mxu0 %v338_v32 }
 0x227   :  { %1111 = vmatpush3.msra.mxu0 %v338_v32 }
 0x228   :  { %1112 = vmatprep.subr.mxu0 %v337_v33 }
 0x229   :  { %1113 = vmatpush3.msra.mxu0 %v337_v33 }
 0x22a   :  { %1115 = vmatmul.mubr.msk.f32.vlgmr.msra.gmra.mxu0 %vm62_vm0, %v1332_v5  ;;  %1117 = vmatprep.subr.mxu0 %v1299_v0 }
 0x22b   :  { %1118 = vmatpush3.msra.mxu0 %v1299_v0  ;;  %v848_v0 = vld [vmem:[%s1607_s11 + $0x70] sm:$0xff] }
 0x22c   :  { %1119 = vmatprep.subr.mxu0 %v1304_v1  ;;  %1144 = vmatprep.subr.mxu1 %v848_v0 }
 0x22d   :  { %1120 = vmatpush3.msra.mxu0 %v1304_v1  ;;  %v847_v1 = vld [vmem:[%s1607_s11 + $0x68] sm:$0xff]  ;;  %1145 = vmatpush3.msra.mxu1 %v848_v0 }
 0x22e   :  { %1121 = vmatprep.subr.mxu0 %v1316_v3  ;;  %1146 = vmatprep.subr.mxu1 %v847_v1 }
 0x22f   :  { %1122 = vmatpush3.msra.mxu0 %v1316_v3  ;;  %v846_v3 = vld [vmem:[%s1607_s11 + $0x60] sm:$0xff]  ;;  %1147 = vmatpush3.msra.mxu1 %v847_v1 }
 0x230   :  { %1123 = vmatprep.subr.mxu0 %v1325_v4  ;;  %1148 = vmatprep.subr.mxu1 %v846_v3 }
 0x231   :  { %1124 = vmatpush3.msra.mxu0 %v1325_v4  ;;  %v845_v4 = vld [vmem:[%s1607_s11 + $0x58] sm:$0xff]  ;;  %1149 = vmatpush3.msra.mxu1 %v846_v3 }
 0x232   :  { %1150 = vmatprep.subr.mxu1 %v845_v4 }
 0x233   :  { %1151 = vmatpush3.msra.mxu1 %v845_v4 }
 0x234   :  { %1152 = vmatprep.subr.mxu1 %v844_v35 }
 0x235   :  { %1153 = vmatpush3.msra.mxu1 %v844_v35 }
 0x236   :  { %1154 = vmatprep.subr.mxu1 %v843_v36 }
 0x237   :  { %1155 = vmatpush3.msra.mxu1 %v843_v36 }
 0x238   :  { %1156 = vmatprep.subr.mxu1 %v842_v37 }
 0x239   :  { %1157 = vmatpush3.msra.mxu1 %v842_v37 }
 0x23a   :  { %1158 = vmatprep.subr.mxu1 %v841_v38 }
 0x23b   :  { %1159 = vmatpush3.msra.mxu1 %v841_v38 }
 0x23c   :  { %1160 = vmatprep.subr.mxu1 %v840_v39 }
 0x23d   :  { %1161 = vmatpush3.msra.mxu1 %v840_v39 }
 0x23e   :  { %1162 = vmatprep.subr.mxu1 %v839_v40 }
 0x23f   :  { %1163 = vmatpush3.msra.mxu1 %v839_v40 }
 0x240   :  { %1164 = vmatprep.subr.mxu1 %v838_v41 }
 0x241   :  { %1165 = vmatpush3.msra.mxu1 %v838_v41 }
 0x242   :  { %1166 = vmatprep.subr.mxu1 %v837_v53 }
 0x243   :  { %1167 = vmatpush3.msra.mxu1 %v837_v53 }
 0x2e2   :  { %v1105_v42 = vpop.f32.mrf.mxu0 }
 0x2e4   :  { %v415_v43 = vpop.f32.mrf.mxu0 }
 0x2ea   :  { %v1116_v44 = vpop.f32.mrf.mxu0 }
 0x2eb   :  { %v496_v46 = vadd.f32 %v1116_v44, %v1105_v42 }
 0x2ec   :  { %v490_v47 = vpop.f32.mrf.mxu0 }
 0x2ed   :  { %v507_v48 = vadd.f32 %v979_v45, %v496_v46  ;;  %v491_v49 = vadd.f32 %v490_v47, %v415_v43 }
 0x2ef   :  { %v509_v50 = vadd.f32 %v507_v48, %v1332_v5  ;;  %v506_v51 = vadd.f32 %v979_v45, %v491_v49  ;;  %v592_v5 = vld [vmem:[%s1605_s9 + $0x8] sm:$0xff] }
 0x2f0   :  { %1128 = vmatprep.subr.mxu0 %v592_v5 }
 0x2f1   :  { %950 = vst.msk [vmem:[#allocation2 + $0x8] sm:$0xff] %vm62_vm0, %v509_v50  ;;  %v508_v52 = vadd.f32 %v506_v51, %v1310_v2  ;;  %v836_v2 = vld [vmem:[%s1607_s11 + $0x10] sm:$0xff]  ;;  %s956_s11 = sshll.u32 %s1218_s10, 4  ;;  %s957_s11 = int_to_ptr.vmem [resolvable:$true] %s956_s11 }
 0x2f2   :  { %1168 = vmatprep.subr.mxu1 %v836_v2  ;;  %p1193_p1 = scmp.lt.s32.totalorder %s957_s11, %s957_s11 }
 0x2f3   :  { %949 = vst.msk [vmem:[#allocation2] sm:$0xff] %vm62_vm0, %v508_v52  ;;  %1125 = vmatprep.mubr.msk.f32.mxu0 %vm62_vm0, %v508_v52  ;;  %1169 = vmatpush3.msra.mxu1 %v836_v2 }
 0x2f4   :  { %1126 = vmatmul.mubr.msk.f32.vlgmr.msra.gmra.mxu0 %vm62_vm0, %v509_v50  ;;  %1170 = vmatprep.subr.mxu1 %v835_v55 }
 0x2f5   :  { %1129 = vmatpush3.msra.mxu0 %v592_v5  ;;  %1171 = vmatpush3.msra.mxu1 %v835_v55 }
 0x2f6   :  { %1130 = vmatprep.subr.mxu0 %v591_v54  ;;  %1172 = vmatprep.subr.mxu1 %v834_v57 }
 0x2f7   :  { %1131 = vmatpush3.msra.mxu0 %v591_v54  ;;  %1173 = vmatpush3.msra.mxu1 %v834_v57 }
 0x2f8   :  { %1135 = vmatprep.subr.mxu0 %v682_v56  ;;  %1175 = vmatmul.mubr.f32.vlgmr.msra.gmra.mxu1 %v1431_v19 }
 0x3b4   :  { %v1127_v58 = vpop.f32.mrf.mxu0 }
 0x3b5   :  { %v588_v61 = vadd.f32 %v1127_v58, %v1362_v13 }
 0x3b6   :  { %v582_v59 = vpop.f32.mrf.mxu0 }
 0x3b7   :  { %v583_v60 = vadd.f32 %v1362_v13, %v582_v59 }
 0x3b9   :  { %1132 = vmatprep.mubr.msk.f32.mxu0 %vm191_vm2, %v583_v60 }
 0x3ba   :  { %1133 = vmatmul.mubr.msk.f32.vlgmr.msra.gmra.mxu0 %vm191_vm2, %v588_v61 }
 0x3bb   :  { %1136 = vmatpush3.msra.mxu0 %v682_v56  ;;  %1139 = vmatprep.mubr.msk.f32.mxu0 %vm191_vm2, %v583_v60 }
 0x3bc   :  { %1137 = vmatprep.subr.mxu0 %v681_v62 }
 0x3bd   :  { %1138 = vmatpush3.msra.mxu0 %v681_v62 }
 0x3be   :  { %1140 = vmatmul.mubr.msk.f32.vlgmr.msra.gmra.mxu0 %vm191_vm2, %v588_v61 }
 0x47a   :  { %v1548_v63 = vpop.f32.mrf.mxu0 }
 0x47c   :  { %v672_v6 = vpop.f32.mrf.mxu0 }
 0x47e   :  { %v1141_v8 = vpop.f32.mrf.mxu0 }
 0x47f   :  { %v760_v9 = vrot.slane %v1141_v8, 7  ;;  %v769_v11 = vrot.slane %v1141_v8, 1  ;;  %v781_v22 = vrot.slane %v1141_v8, 3  ;;  %v775_v23 = vrot.slane %v1141_v8, 2 }
 0x480   :  { %v749_v13 = vpop.f32.mrf.mxu0  ;;  %v793_v28 = vrot.slane %v1141_v8, 5  ;;  %v787_v29 = vrot.slane %v1141_v8, 4  ;;  %v799_v33 = vrot.slane %v1141_v8, 6 }
 0x481   :  { %v768_v10 = vrot.slane %v749_v13, 2  ;;  %v763_v14 = vrot.slane %v749_v13, 1  ;;  %v761_v15 = vsel %vm147_vm1, %v760_v9, %v749_v13  ;;  %v780_v20 = vrot.slane %v749_v13, 4 }
 0x482   :  { %v774_v21 = vrot.slane %v749_v13, 3  ;;  %v792_v26 = vrot.slane %v749_v13, 6  ;;  %v786_v27 = vrot.slane %v749_v13, 5  ;;  %v798_v32 = vrot.slane %v749_v13, 7 }
 0x483   :  { %v770_v17 = vsel %vm147_vm1, %v769_v11, %v768_v10  ;;  %v764_v18 = vsel %vm147_vm1, %v1141_v8, %v763_v14  ;;  %v782_v24 = vsel %vm147_vm1, %v781_v22, %v780_v20 }
 0x484   :  { %771 = vrot.lane.b32.xlu0 %v770_v17, %s1213_s19  ;;  %765 = vrot.lane.b32.xlu1 %v764_v18, %s1211_s29  ;;  %v776_v25 = vsel %vm147_vm1, %v775_v23, %v774_v21  ;;  %v794_v30 = vsel %vm147_vm1, %v793_v28, %v792_v26  ;;  %v788_v31 = vsel %vm147_vm1, %v787_v29, %v786_v27 }
 0x485   :  { %v800_v34 = vsel %vm147_vm1, %v799_v33, %v798_v32 }
 0x488   :  { %783 = vrot.lane.b32.xlu0 %v782_v24, %s1212_s18  ;;  %777 = vrot.lane.b32.xlu1 %v776_v25, %s1210_s0  ;;  %s1188_s0 = scalar_lea.vmem %s957_s11, 256 }
 0x489   :  { %p1189_p0 = scmp.ne.s32.totalorder %s957_s11, %s1188_s0  ;;  %p1194_p2 = scmp.lt.s32.totalorder %s1188_s0, %s1188_s0 }
 0x48b   :  { %p1195_p3 = por %p1194_p2, %p1193_p1 }
 0x48c   :  { %795 = vrot.lane.b32.xlu0 %v794_v30, %s1214_s24  ;;  %789 = vrot.lane.b32.xlu1 %v788_v31, %s1215_s25 }
 0x48d   :  { %p1196_p4 = pnand %p1195_p3, %p1189_p0 }
 0x490   :  { %801 = vrot.lane.b32.xlu1 %v800_v34, %s1216_s2 }
 0x491   :  { %1199 = shalt.err (!%p1196_p4)
}
 0x492   :  { %s1219_s29 = smov 128   ;;  %s1220_s18 = smov 8   ;;  %v1176_v42 = vpop.f32.mrf.mxu1  ;;  %v982_v45 = vld [vmem:[%s1608_s12] ss:$0 sm:$0xff]  ;;  %vm939_vm8 = vcmp.gt.f32.partialorder %v1424_v16, 0.0  ;;  %vm940_vm9 = vcmp.gt.f32.partialorder %v1431_v19, 0.0 }
 0x493   :  { %962 = dma.vmem_to_hbm [thread:$0]  %s957_s11, 256, %s1609_s13, [#allocation3], %s1219_s29, %s1219_s29, %s1220_s18   ;;  %v673_v47 = vadd.f32 %v982_v45, %v672_v6  ;;  %v678_v50 = vadd.f32 %v1548_v63, %v982_v45 }
 0x494   :  { %v916_v49 = vpop.f32.mrf.mxu1 }
 0x495   :  { %v925_v53 = vadd.f32 %v916_v49, %v673_v47  ;;  %v926_v54 = vadd.f32 %v1176_v42, %v678_v50 }
 0x4f6   :  { %v772_v0 = vpop.permute.xlu0 %771  ;;  %v766_v1 = vpop.permute.xlu1 %765 }
 0x4f7   :  { %v804_v3 = vsel %vm191_vm2, %v761_v15, %v766_v1 }
 0x4f8   :  { %v805_v36 = vsel %vm62_vm0, %v804_v3, %v772_v0 }
 0x4fa   :  { %v784_v4 = vpop.permute.xlu0 %783  ;;  %v778_v35 = vpop.permute.xlu1 %777 }
 0x4fb   :  { %v806_v37 = vsel %vm194_vm3, %v805_v36, %v778_v35 }
 0x4fc   :  { %v807_v39 = vsel %vm196_vm4, %v806_v37, %v784_v4 }
 0x4fe   :  { %v790_v38 = vpop.permute.xlu1 %789  ;;  %v796_v40 = vpop.permute.xlu0 %795 }
 0x4ff   :  { %v808_v41 = vsel %vm198_vm5, %v807_v39, %v790_v38 }
 0x500   :  { %v809_v44 = vsel %vm200_vm6, %v808_v41, %v796_v40 }
 0x502   :  { %v802_v43 = vpop.permute.xlu1 %801 }
 0x503   :  { %v810_v46 = vsel %vm202_vm7, %v809_v44, %v802_v43 }
 0x504   :  { %v818_v48 = vrot.slane %v810_v46, %v1413_v7 }
 0x506   :  { %v819_v51 = vcombine.high %v818_v48, %v818_v48  ;;  %v826_v52 = vrot.slane %v818_v48, %v1413_v7 }
 0x508   :  { %v833_v5 = vrot.slane %v819_v51, %v1413_v7  ;;  %v930_v2 = vrot.slane %v826_v52, %v1418_v12 }
 0x50a   :  { %v934_v55 = vrot.slane %v833_v5, %v1418_v12  ;;  %v937_v56 = vadd.f32 %v930_v2, %v925_v53 }
 0x50c   :  { %v938_v57 = vadd.f32 %v934_v55, %v926_v54  ;;  %v941_v58 = vmul.f32 0.2, %v937_v56 }
 0x50e   :  { %v942_v59 = vmul.f32 0.2, %v938_v57  ;;  %v943_v60 = vadd.f32 %v941_v58, %v1424_v16 }
 0x510   :  { %v944_v61 = vadd.f32 %v942_v59, %v1431_v19  ;;  %v945_v62 = vsel %vm939_vm8, %v943_v60, %v1424_v16 }
 0x511   :  { %947 = vst [vmem:[%s1610_s14] sm:$0xff] %v945_v62 }
 0x512   :  { %v946_v7 = vsel %vm940_vm9, %v944_v61, %v1431_v19 }
 0x513   :  { %948 = vst [vmem:[%s1610_s14 + $0x8] sm:$0xff] %v946_v7 }
 0x514   :  { %1208 = dma.done.wait [#allocation3], 256  }
 0x515   :  { %1209 = vsyncadd [#allocation3], 4294967040 }
 0x516   :  { %970 = vsyncpa [#allocation3], 1 }

</bundles_post_ra>
